<compile_context>
chip_gen: v6e
topology: v6e:2x2x1
jax: 0.10.0
libtpu: 0.0.40
codegen_flags: <defaults>
</compile_context>

<pallas_src>
import math

import jax
import jax.numpy as jnp
import numpy as np
from jax import lax
from jax.experimental import pallas as pl
from jax.experimental.pallas import tpu as pltpu


def _make_attention_kernel(heads: int, dim_head: int):
    inner = heads * dim_head
    scale = dim_head ** -0.5  # SDPA default scale (module's self.scale is unused)

    def kernel(x_ref, c_ref, wq_ref, wkv_ref, wo_ref, o_ref, oh_ref):
        cdtype = x_ref.dtype                 # MXU operand dtype (bf16)
        x = x_ref[...]                       # (N, Dq)
        c = c_ref[...]                       # (M, Dc)

        # ---- fused projections (2 matmuls total, lane-dense outputs) ----
        q_all = jnp.dot(x, wq_ref[...], preferred_element_type=jnp.float32)   # (N, H*Dh)
        kv_all = jnp.dot(c, wkv_ref[...], preferred_element_type=jnp.float32)  # (M, 2*H*Dh)
        q_all = (q_all * scale).astype(cdtype)   # scale folded once into Q
        kv_all = kv_all.astype(cdtype)

        # ---- per-head attention (tiny static unroll, H=4) ----
        for h in range(heads):
            lo = h * dim_head
            q = q_all[:, lo:lo + dim_head]                       # (N, Dh)
            k = kv_all[:, lo:lo + dim_head]                      # (M, Dh)
            v = kv_all[:, inner + lo:inner + lo + dim_head]      # (M, Dh)

            # q @ k.T without materializing a transpose.
            s = lax.dot_general(q, k, (((1,), (1,)), ((), ())),
                                preferred_element_type=jnp.float32)   # (N, M) f32

            # numerically stable softmax in f32; reciprocal on the EUP.
            m = jnp.max(s, axis=-1, keepdims=True)
            p = jnp.exp(s - m)
            l = jnp.sum(p, axis=-1, keepdims=True)
            p = (p * pl.reciprocal(l, approx=False)).astype(cdtype)

            oh = jnp.dot(p, v, preferred_element_type=jnp.float32)   # (N, Dh)
            oh_ref[:, lo:lo + dim_head] = oh.astype(cdtype)          # static lane offset

        # ---- fused output projection: one (N, H*Dh) @ (H*Dh, Dq) matmul ----
        o_ref[...] = jnp.dot(oh_ref[...], wo_ref[...],
                             preferred_element_type=jnp.float32).astype(o_ref.dtype)

    return kernel


def attention_forward(x, params, *, heads, dim_head, context=None):
    """Pallas implementation of Attention.forward(x, context=None, mask=None).

    (The PyTorch module accepts `mask` but never uses it, so it is omitted.)
    params = (wq: (Dq, H*Dh), wkv: (Dc, 2*H*Dh), wo: (H*Dh, Dq)), matching the
    module's to_q / to_kv / to_out Linear layers (stored as (in, out)).
    """
    if context is None:
        context = x
    B, N, Dq = x.shape
    _, M, Dc = context.shape
    wq, wkv, wo = params
    inner = heads * dim_head

    kernel = _make_attention_kernel(heads, dim_head)
    return pl.pallas_call(
        kernel,
        out_shape=jax.ShapeDtypeStruct((B, N, Dq), x.dtype),
        grid_spec=pltpu.PrefetchScalarGridSpec(
            num_scalar_prefetch=0,
            grid=(B,),
            in_specs=[
                pl.BlockSpec((None, N, Dq), lambda b: (b, 0, 0)),   # x, per batch
                pl.BlockSpec((None, M, Dc), lambda b: (b, 0, 0)),   # context, per batch
                pl.BlockSpec((Dq, inner), lambda b: (0, 0)),        # Wq (resident)
                pl.BlockSpec((Dc, 2 * inner), lambda b: (0, 0)),    # Wkv (resident)
                pl.BlockSpec((inner, Dq), lambda b: (0, 0)),        # Wo (resident)
            ],
            out_specs=pl.BlockSpec((None, N, Dq), lambda b: (b, 0, 0)),
            scratch_shapes=[pltpu.VMEM((N, inner), x.dtype)],       # per-head outputs
        ),
        compiler_params=pltpu.CompilerParams(
            dimension_semantics=("parallel",)),   # batch axis -> both v7x TCs
    )(x, context, wq, wkv, wo)


def attention_reference(x, params, *, heads, dim_head, context=None):
    """Plain-JAX (f32) reference mirroring the PyTorch module."""
    if context is None:
        context = x
    wq, wkv, wo = params
    x = x.astype(jnp.float32)
    context = context.astype(jnp.float32)
    wq, wkv, wo = (w.astype(jnp.float32) for w in (wq, wkv, wo))
    B, N, _ = x.shape
    M = context.shape[1]
    inner = heads * dim_head

    q = x @ wq
    kv = context @ wkv
    k, v = kv[..., :inner], kv[..., inner:]

    def split_heads(t, L):
        return t.reshape(B, L, heads, dim_head).transpose(0, 2, 1, 3)

    qh, kh, vh = split_heads(q, N), split_heads(k, M), split_heads(v, M)
    s = jnp.einsum("bhnd,bhmd->bhnm", qh, kh) * (dim_head ** -0.5)
    p = jax.nn.softmax(s, axis=-1)
    o = jnp.einsum("bhnm,bhmd->bhnd", p, vh)
    o = o.transpose(0, 2, 1, 3).reshape(B, N, inner)
    return o @ wo


if __name__ == "__main__":
    # Module config (small shapes): query_dim=32, context_dim=32, heads=4, dim_head=16
    query_dim = 32
    context_dim = 32
    heads = 4
    dim_head = 16
    inner_dim = heads * dim_head  # 64 -> Wkv output is exactly 128 lanes

    B, N = 2, 8  # batch, seq

    key = jax.random.PRNGKey(0)
    kx, kq, kkv, ko = jax.random.split(key, 4)

    x = jax.random.normal(kx, (B, N, query_dim), dtype=jnp.float32)

    # Deterministic parameter init (Linear weights, bias=False), stored as (in, out).
    wq = 0.05 * jax.random.normal(kq, (query_dim, inner_dim), dtype=jnp.float32)
    wkv = 0.05 * jax.random.normal(kkv, (context_dim, 2 * inner_dim), dtype=jnp.float32)
    wo = 0.05 * jax.random.normal(ko, (inner_dim, query_dim), dtype=jnp.float32)

    # bf16 operands: native MXU path on v6e/v7x, halves DMA bytes & VMEM.
    x_bf = x.astype(jnp.bfloat16)
    params_bf = tuple(w.astype(jnp.bfloat16) for w in (wq, wkv, wo))

    out = attention_forward(x_bf, params_bf, heads=heads, dim_head=dim_head)
    out = jax.block_until_ready(out)

    # Reference in f32 arithmetic from the SAME bf16-quantized values, so the
    # comparison isolates kernel error (bf16 intermediate rounding only).
    ref = attention_reference(x_bf, params_bf, heads=heads, dim_head=dim_head)
    np.testing.assert_allclose(np.asarray(out, dtype=np.float32), np.asarray(ref),
                               rtol=2e-2, atol=2e-2)

    print("KERNEL_OK")
</pallas_src>

<mosaic_0001>
module attributes {stable_mosaic.version = 11 : i64} {
  func.func @kernel(%arg0: i32, %arg1: memref<1x8x32xbf16, #tpu.memory_space<vmem>>, %arg2: memref<1x8x32xbf16, #tpu.memory_space<vmem>>, %arg3: memref<32x64xbf16, #tpu.memory_space<vmem>>, %arg4: memref<32x128xbf16, #tpu.memory_space<vmem>>, %arg5: memref<64x32xbf16, #tpu.memory_space<vmem>>, %arg6: memref<1x8x32xbf16, #tpu.memory_space<vmem>>, %arg7: memref<8x64xbf16, #tpu.memory_space<vmem>>) attributes {dimension_semantics = [#tpu.dimension_semantics<parallel>], iteration_bounds = array<i64: 2>, scalar_prefetch = 0 : i64, scratch_operands = 1 : i64, tpu.core_type = #tpu.core_type<tc>, window_params = [{transform_indices = @transform_0, window_bounds = array<i64: 1, 8, 32>}, {transform_indices = @transform_1, window_bounds = array<i64: 1, 8, 32>}, {pipeline_mode = #tpu.pipeline_mode<synchronous>, transform_indices = @transform_2, window_bounds = array<i64: 32, 64>}, {pipeline_mode = #tpu.pipeline_mode<synchronous>, transform_indices = @transform_3, window_bounds = array<i64: 32, 128>}, {pipeline_mode = #tpu.pipeline_mode<synchronous>, transform_indices = @transform_4, window_bounds = array<i64: 64, 32>}, {transform_indices = @transform_5, window_bounds = array<i64: 1, 8, 32>}]} {
    %c0 = arith.constant 0 : index
    %c0_0 = arith.constant 0 : index
    %c0_1 = arith.constant 0 : index
    %0 = vector.load %arg1[%c0, %c0_0, %c0_1] : memref<1x8x32xbf16, #tpu.memory_space<vmem>>, vector<1x8x32xbf16>
    %1 = vector.shape_cast %0 : vector<1x8x32xbf16> to vector<8x32xbf16>
    %c0_2 = arith.constant 0 : index
    %c0_3 = arith.constant 0 : index
    %c0_4 = arith.constant 0 : index
    %2 = vector.load %arg2[%c0_2, %c0_3, %c0_4] : memref<1x8x32xbf16, #tpu.memory_space<vmem>>, vector<1x8x32xbf16>
    %3 = vector.shape_cast %2 : vector<1x8x32xbf16> to vector<8x32xbf16>
    %c0_5 = arith.constant 0 : index
    %c0_6 = arith.constant 0 : index
    %4 = vector.load %arg3[%c0_5, %c0_6] : memref<32x64xbf16, #tpu.memory_space<vmem>>, vector<32x64xbf16>
    %cst = arith.constant dense<0.000000e+00> : vector<8x64xf32>
    %5 = tpu.matmul %1, %4, %cst {dimension_numbers = #tpu.dot_dimension_numbers<[1], [0], [0], [1], [0, 0, 1, 1], [], []>} : vector<8x32xbf16>, vector<32x64xbf16>, vector<8x64xf32> -> vector<8x64xf32>
    %c0_7 = arith.constant 0 : index
    %c0_8 = arith.constant 0 : index
    %6 = vector.load %arg4[%c0_7, %c0_8] : memref<32x128xbf16, #tpu.memory_space<vmem>>, vector<32x128xbf16>
    %cst_9 = arith.constant dense<0.000000e+00> : vector<8x128xf32>
    %7 = tpu.matmul %3, %6, %cst_9 {dimension_numbers = #tpu.dot_dimension_numbers<[1], [0], [0], [1], [0, 0, 1, 1], [], []>} : vector<8x32xbf16>, vector<32x128xbf16>, vector<8x128xf32> -> vector<8x128xf32>
    %cst_10 = arith.constant 2.500000e-01 : f32
    %8 = vector.broadcast %cst_10 : f32 to vector<8x64xf32>
    %9 = arith.mulf %5, %8 : vector<8x64xf32>
    %10 = arith.truncf %9 : vector<8x64xf32> to vector<8x64xbf16>
    %11 = arith.truncf %7 : vector<8x128xf32> to vector<8x128xbf16>
    %12 = vector.extract_strided_slice %10 {offsets = [0, 0], sizes = [8, 16], strides = [1, 1]} : vector<8x64xbf16> to vector<8x16xbf16>
    %13 = vector.extract_strided_slice %11 {offsets = [0, 0], sizes = [8, 16], strides = [1, 1]} : vector<8x128xbf16> to vector<8x16xbf16>
    %14 = vector.extract_strided_slice %11 {offsets = [0, 64], sizes = [8, 16], strides = [1, 1]} : vector<8x128xbf16> to vector<8x16xbf16>
    %cst_11 = arith.constant dense<0.000000e+00> : vector<8x8xf32>
    %15 = tpu.matmul %12, %13, %cst_11 {dimension_numbers = #tpu.dot_dimension_numbers<[1], [1], [0], [0], [0, 0, 1, 0], [], []>} : vector<8x16xbf16>, vector<8x16xbf16>, vector<8x8xf32> -> vector<8x8xf32>
    %cst_12 = arith.constant dense<0xFF800000> : vector<8xf32>
    %16 = vector.multi_reduction <maximumf>, %15, %cst_12 [1] : vector<8x8xf32> to vector<8xf32>
    %17 = vector.shape_cast %16 : vector<8xf32> to vector<8x1xf32>
    %18 = vector.broadcast %17 : vector<8x1xf32> to vector<8x8xf32>
    %19 = arith.subf %15, %18 : vector<8x8xf32>
    %20 = math.exp %19 : vector<8x8xf32>
    %cst_13 = arith.constant dense<0.000000e+00> : vector<8xf32>
    %21 = vector.multi_reduction <add>, %20, %cst_13 [1] : vector<8x8xf32> to vector<8xf32>
    %22 = vector.shape_cast %21 : vector<8xf32> to vector<8x1xf32>
    %23 = tpu.reciprocal %22 : vector<8x1xf32> -> vector<8x1xf32>
    %24 = vector.broadcast %23 : vector<8x1xf32> to vector<8x8xf32>
    %25 = arith.mulf %20, %24 : vector<8x8xf32>
    %26 = arith.truncf %25 : vector<8x8xf32> to vector<8x8xbf16>
    %cst_14 = arith.constant dense<0.000000e+00> : vector<8x16xf32>
    %27 = tpu.matmul %26, %14, %cst_14 {dimension_numbers = #tpu.dot_dimension_numbers<[1], [0], [0], [1], [0, 0, 1, 1], [], []>} : vector<8x8xbf16>, vector<8x16xbf16>, vector<8x16xf32> -> vector<8x16xf32>
    %28 = arith.truncf %27 : vector<8x16xf32> to vector<8x16xbf16>
    %c0_15 = arith.constant 0 : index
    %c0_16 = arith.constant 0 : index
    %29 = vector.load %arg7[%c0_15, %c0_16] : memref<8x64xbf16, #tpu.memory_space<vmem>>, vector<8x16xbf16>
    tpu.vector_store %arg7[%c0_15, %c0_16], %28 {strides = array<i32>} : memref<8x64xbf16, #tpu.memory_space<vmem>>, vector<8x16xbf16>,
    %30 = vector.extract_strided_slice %10 {offsets = [0, 16], sizes = [8, 16], strides = [1, 1]} : vector<8x64xbf16> to vector<8x16xbf16>
    %31 = vector.extract_strided_slice %11 {offsets = [0, 16], sizes = [8, 16], strides = [1, 1]} : vector<8x128xbf16> to vector<8x16xbf16>
    %32 = vector.extract_strided_slice %11 {offsets = [0, 80], sizes = [8, 16], strides = [1, 1]} : vector<8x128xbf16> to vector<8x16xbf16>
    %cst_17 = arith.constant dense<0.000000e+00> : vector<8x8xf32>
    %33 = tpu.matmul %30, %31, %cst_17 {dimension_numbers = #tpu.dot_dimension_numbers<[1], [1], [0], [0], [0, 0, 1, 0], [], []>} : vector<8x16xbf16>, vector<8x16xbf16>, vector<8x8xf32> -> vector<8x8xf32>
    %cst_18 = arith.constant dense<0xFF800000> : vector<8xf32>
    %34 = vector.multi_reduction <maximumf>, %33, %cst_18 [1] : vector<8x8xf32> to vector<8xf32>
    %35 = vector.shape_cast %34 : vector<8xf32> to vector<8x1xf32>
    %36 = vector.broadcast %35 : vector<8x1xf32> to vector<8x8xf32>
    %37 = arith.subf %33, %36 : vector<8x8xf32>
    %38 = math.exp %37 : vector<8x8xf32>
    %cst_19 = arith.constant dense<0.000000e+00> : vector<8xf32>
    %39 = vector.multi_reduction <add>, %38, %cst_19 [1] : vector<8x8xf32> to vector<8xf32>
    %40 = vector.shape_cast %39 : vector<8xf32> to vector<8x1xf32>
    %41 = tpu.reciprocal %40 : vector<8x1xf32> -> vector<8x1xf32>
    %42 = vector.broadcast %41 : vector<8x1xf32> to vector<8x8xf32>
    %43 = arith.mulf %38, %42 : vector<8x8xf32>
    %44 = arith.truncf %43 : vector<8x8xf32> to vector<8x8xbf16>
    %cst_20 = arith.constant dense<0.000000e+00> : vector<8x16xf32>
    %45 = tpu.matmul %44, %32, %cst_20 {dimension_numbers = #tpu.dot_dimension_numbers<[1], [0], [0], [1], [0, 0, 1, 1], [], []>} : vector<8x8xbf16>, vector<8x16xbf16>, vector<8x16xf32> -> vector<8x16xf32>
    %46 = arith.truncf %45 : vector<8x16xf32> to vector<8x16xbf16>
    %c0_21 = arith.constant 0 : index
    %c16 = arith.constant 16 : index
    %47 = vector.load %arg7[%c0_21, %c16] : memref<8x64xbf16, #tpu.memory_space<vmem>>, vector<8x16xbf16>
    tpu.vector_store %arg7[%c0_21, %c16], %46 {strides = array<i32>} : memref<8x64xbf16, #tpu.memory_space<vmem>>, vector<8x16xbf16>,
    %48 = vector.extract_strided_slice %10 {offsets = [0, 32], sizes = [8, 16], strides = [1, 1]} : vector<8x64xbf16> to vector<8x16xbf16>
    %49 = vector.extract_strided_slice %11 {offsets = [0, 32], sizes = [8, 16], strides = [1, 1]} : vector<8x128xbf16> to vector<8x16xbf16>
    %50 = vector.extract_strided_slice %11 {offsets = [0, 96], sizes = [8, 16], strides = [1, 1]} : vector<8x128xbf16> to vector<8x16xbf16>
    %cst_22 = arith.constant dense<0.000000e+00> : vector<8x8xf32>
    %51 = tpu.matmul %48, %49, %cst_22 {dimension_numbers = #tpu.dot_dimension_numbers<[1], [1], [0], [0], [0, 0, 1, 0], [], []>} : vector<8x16xbf16>, vector<8x16xbf16>, vector<8x8xf32> -> vector<8x8xf32>
    %cst_23 = arith.constant dense<0xFF800000> : vector<8xf32>
    %52 = vector.multi_reduction <maximumf>, %51, %cst_23 [1] : vector<8x8xf32> to vector<8xf32>
    %53 = vector.shape_cast %52 : vector<8xf32> to vector<8x1xf32>
    %54 = vector.broadcast %53 : vector<8x1xf32> to vector<8x8xf32>
    %55 = arith.subf %51, %54 : vector<8x8xf32>
    %56 = math.exp %55 : vector<8x8xf32>
    %cst_24 = arith.constant dense<0.000000e+00> : vector<8xf32>
    %57 = vector.multi_reduction <add>, %56, %cst_24 [1] : vector<8x8xf32> to vector<8xf32>
    %58 = vector.shape_cast %57 : vector<8xf32> to vector<8x1xf32>
    %59 = tpu.reciprocal %58 : vector<8x1xf32> -> vector<8x1xf32>
    %60 = vector.broadcast %59 : vector<8x1xf32> to vector<8x8xf32>
    %61 = arith.mulf %56, %60 : vector<8x8xf32>
    %62 = arith.truncf %61 : vector<8x8xf32> to vector<8x8xbf16>
    %cst_25 = arith.constant dense<0.000000e+00> : vector<8x16xf32>
    %63 = tpu.matmul %62, %50, %cst_25 {dimension_numbers = #tpu.dot_dimension_numbers<[1], [0], [0], [1], [0, 0, 1, 1], [], []>} : vector<8x8xbf16>, vector<8x16xbf16>, vector<8x16xf32> -> vector<8x16xf32>
    %64 = arith.truncf %63 : vector<8x16xf32> to vector<8x16xbf16>
    %c0_26 = arith.constant 0 : index
    %c32 = arith.constant 32 : index
    %65 = vector.load %arg7[%c0_26, %c32] : memref<8x64xbf16, #tpu.memory_space<vmem>>, vector<8x16xbf16>
    tpu.vector_store %arg7[%c0_26, %c32], %64 {strides = array<i32>} : memref<8x64xbf16, #tpu.memory_space<vmem>>, vector<8x16xbf16>,
    %66 = vector.extract_strided_slice %10 {offsets = [0, 48], sizes = [8, 16], strides = [1, 1]} : vector<8x64xbf16> to vector<8x16xbf16>
    %67 = vector.extract_strided_slice %11 {offsets = [0, 48], sizes = [8, 16], strides = [1, 1]} : vector<8x128xbf16> to vector<8x16xbf16>
    %68 = vector.extract_strided_slice %11 {offsets = [0, 112], sizes = [8, 16], strides = [1, 1]} : vector<8x128xbf16> to vector<8x16xbf16>
    %cst_27 = arith.constant dense<0.000000e+00> : vector<8x8xf32>
    %69 = tpu.matmul %66, %67, %cst_27 {dimension_numbers = #tpu.dot_dimension_numbers<[1], [1], [0], [0], [0, 0, 1, 0], [], []>} : vector<8x16xbf16>, vector<8x16xbf16>, vector<8x8xf32> -> vector<8x8xf32>
    %cst_28 = arith.constant dense<0xFF800000> : vector<8xf32>
    %70 = vector.multi_reduction <maximumf>, %69, %cst_28 [1] : vector<8x8xf32> to vector<8xf32>
    %71 = vector.shape_cast %70 : vector<8xf32> to vector<8x1xf32>
    %72 = vector.broadcast %71 : vector<8x1xf32> to vector<8x8xf32>
    %73 = arith.subf %69, %72 : vector<8x8xf32>
    %74 = math.exp %73 : vector<8x8xf32>
    %cst_29 = arith.constant dense<0.000000e+00> : vector<8xf32>
    %75 = vector.multi_reduction <add>, %74, %cst_29 [1] : vector<8x8xf32> to vector<8xf32>
    %76 = vector.shape_cast %75 : vector<8xf32> to vector<8x1xf32>
    %77 = tpu.reciprocal %76 : vector<8x1xf32> -> vector<8x1xf32>
    %78 = vector.broadcast %77 : vector<8x1xf32> to vector<8x8xf32>
    %79 = arith.mulf %74, %78 : vector<8x8xf32>
    %80 = arith.truncf %79 : vector<8x8xf32> to vector<8x8xbf16>
    %cst_30 = arith.constant dense<0.000000e+00> : vector<8x16xf32>
    %81 = tpu.matmul %80, %68, %cst_30 {dimension_numbers = #tpu.dot_dimension_numbers<[1], [0], [0], [1], [0, 0, 1, 1], [], []>} : vector<8x8xbf16>, vector<8x16xbf16>, vector<8x16xf32> -> vector<8x16xf32>
    %82 = arith.truncf %81 : vector<8x16xf32> to vector<8x16xbf16>
    %c0_31 = arith.constant 0 : index
    %c48 = arith.constant 48 : index
    %83 = vector.load %arg7[%c0_31, %c48] : memref<8x64xbf16, #tpu.memory_space<vmem>>, vector<8x16xbf16>
    tpu.vector_store %arg7[%c0_31, %c48], %82 {strides = array<i32>} : memref<8x64xbf16, #tpu.memory_space<vmem>>, vector<8x16xbf16>,
    %c0_32 = arith.constant 0 : index
    %c0_33 = arith.constant 0 : index
    %84 = vector.load %arg7[%c0_32, %c0_33] : memref<8x64xbf16, #tpu.memory_space<vmem>>, vector<8x64xbf16>
    %c0_34 = arith.constant 0 : index
    %c0_35 = arith.constant 0 : index
    %85 = vector.load %arg5[%c0_34, %c0_35] : memref<64x32xbf16, #tpu.memory_space<vmem>>, vector<64x32xbf16>
    %cst_36 = arith.constant dense<0.000000e+00> : vector<8x32xf32>
    %86 = tpu.matmul %84, %85, %cst_36 {dimension_numbers = #tpu.dot_dimension_numbers<[1], [0], [0], [1], [0, 0, 1, 1], [], []>} : vector<8x64xbf16>, vector<64x32xbf16>, vector<8x32xf32> -> vector<8x32xf32>
    %87 = arith.truncf %86 : vector<8x32xf32> to vector<8x32xbf16>
    %c0_37 = arith.constant 0 : index
    %c0_38 = arith.constant 0 : index
    %c0_39 = arith.constant 0 : index
    %88 = vector.load %arg6[%c0_37, %c0_38, %c0_39] : memref<1x8x32xbf16, #tpu.memory_space<vmem>>, vector<1x8x32xbf16>
    %89 = vector.shape_cast %88 : vector<1x8x32xbf16> to vector<8x32xbf16>
    %90 = vector.shape_cast %87 : vector<8x32xbf16> to vector<1x8x32xbf16>
    tpu.vector_store %arg6[%c0_37, %c0_38, %c0_39], %90 {strides = array<i32>} : memref<1x8x32xbf16, #tpu.memory_space<vmem>>, vector<1x8x32xbf16>,
    return
  }
  func.func @transform_0(%arg0: i32) -> (i32, i32, i32) {
    %c0_i32 = arith.constant 0 : i32
    %c0_i32_0 = arith.constant 0 : i32
    %c0_i32_1 = arith.constant 0 : i32
    return %arg0, %c0_i32, %c0_i32_0 : i32, i32, i32
  }
  func.func @transform_1(%arg0: i32) -> (i32, i32, i32) {
    %c0_i32 = arith.constant 0 : i32
    %c0_i32_0 = arith.constant 0 : i32
    %c0_i32_1 = arith.constant 0 : i32
    return %arg0, %c0_i32, %c0_i32_0 : i32, i32, i32
  }
  func.func @transform_2(%arg0: i32) -> (i32, i32) {
    %c0_i32 = arith.constant 0 : i32
    %c0_i32_0 = arith.constant 0 : i32
    %c0_i32_1 = arith.constant 0 : i32
    return %c0_i32, %c0_i32_0 : i32, i32
  }
  func.func @transform_3(%arg0: i32) -> (i32, i32) {
    %c0_i32 = arith.constant 0 : i32
    %c0_i32_0 = arith.constant 0 : i32
    %c0_i32_1 = arith.constant 0 : i32
    return %c0_i32, %c0_i32_0 : i32, i32
  }
  func.func @transform_4(%arg0: i32) -> (i32, i32) {
    %c0_i32 = arith.constant 0 : i32
    %c0_i32_0 = arith.constant 0 : i32
    %c0_i32_1 = arith.constant 0 : i32
    return %c0_i32, %c0_i32_0 : i32, i32
  }
  func.func @transform_5(%arg0: i32) -> (i32, i32, i32) {
    %c0_i32 = arith.constant 0 : i32
    %c0_i32_0 = arith.constant 0 : i32
    %c0_i32_1 = arith.constant 0 : i32
    return %arg0, %c0_i32, %c0_i32_0 : i32, i32, i32
  }
}

</mosaic_0001>

<bundles_post_ra>
// kernel: tpu_custom_call.1
= control target key start
LH: loop header
LB: loop body
LE: loop exit
PB: predicated region body
PF: predicated region fallthrough
CT: control target
= control target key end

     0   :  { %10 = vsyncpa [#allocation4], 0  ;;  %s1517_s0 = inlined_call_operand.vmem [shape: bf16[2,8,32], index: 0, kind: input, shape index: {}]   ;;  %s1518_s1 = inlined_call_operand.vmem [shape: bf16[2,8,32], index: 1, kind: input, shape index: {}]   ;;  %s1519_s2 = inlined_call_operand.vmem [shape: bf16[32,64], index: 2, kind: input, shape index: {}]   ;;  %s1520_s3 = inlined_call_operand.vmem [shape: bf16[32,128], index: 3, kind: input, shape index: {}]   ;;  %s1521_s4 = inlined_call_operand.vmem [shape: bf16[64,32], index: 4, kind: input, shape index: {}]   ;;  %s1522_s5 = inlined_call_operand.hbm [shape: bf16[2,8,32], index: 5, kind: output, shape index: {}]  }
   0x1   :  { %12 = vsyncpa [#allocation4 + $0x1], 0  ;;  %s1311_s18 = smov 0   ;;  %s1313_s19 = smov 0  }
   0x2   :  { %s1315_s20 = smov 0   ;;  %s1317_s21 = smov 0  }
   0x3 LB: > { %s1332_s22 = sadd.s32 4294967295, %s1269_s21   ;;  %s998_s23 = sadd.s32 4294967294, %s1269_s21   ;;  %s1269_s21 = sphi %s1317_s21, %s1528_s21   ;;  %s1265_s20 = sphi %s1315_s20, %s1527_s20   ;;  %s1261_s19 = sphi %s1313_s19, %s1526_s19   ;;  %s1257_s18 = sphi %s1311_s18, %s1525_s18  }
   0x4   : > { %s1336_s24 = sadd.s32 1, %s1269_s21   ;;  %s140_s25 = sadd.s32 1, %s1265_s20 }
   0x5   : > { %s137_s26 = ssub.s32 %s1269_s21, %s1336_s24  ;;  %p150_p0 = scmp.ne.s32.totalorder %s1265_s20, %s1261_s19 }
   0x6   : > { %p138_p1 = scmp.eq.s32.totalorder %s137_s26, 0  ;;  %p151_p2 = scmp.eq.s32.totalorder %s1332_s22, 1 }
   0x7   : > { %p156_p3 = scmp.ne.s32.totalorder %s1261_s19, %s1257_s18  ;;  %p157_p4 = scmp.eq.s32.totalorder %s998_s23, 1 }
   0x8   : > { %s1347_s27 = scalar_select %p138_p1, %s1265_s20, %s140_s25  }
   0x9   : > { %p1349_p5 = por %p151_p2, %p150_p0  ;;  %p1353_p6 = por %p157_p4, %p156_p3 }
   0xa   : > { %p1001_p7 = scmp.ge.s32.totalorder %s1269_s21, 1  ;;  %p198_p8 = scmp.lt.s32.totalorder %s1269_s21, 3 }
   0xc   : > { %p199_p9 = pnand %p1001_p7, %p198_p8 }
   0xd   : > { %p229_p10 = scmp.lt.s32.totalorder (!%p199_p9), %s1332_s22, 1  ;;  %s1273_s30 = smov (!%p199_p9), 96  }
   0xe   : > { %202 = sbr.rel (%p199_p9) target bundleno = 1410 (0x582), region = 40  ;;  %s1274_s6 = smov (!%p199_p9), 112  }
   0xf   : > { %s1275_s7 = smov (!%p199_p9), 80   ;;  %s1276_s8 = smov (!%p199_p9), 64  }
  0x10   : > { %s1279_s11 = smov (!%p199_p9), 48   ;;  %s1280_s13 = smov (!%p199_p9), [#allocation3]  }
  0x11   : > { %s1213_s14 = sshll.u32 (!%p199_p9), %s1280_s13, 4  ;;  %s1214_s14 = int_to_ptr.vmem [resolvable:$false] %s1213_s14 }
  0x13   : > { %v1185_v0 = vld [vmem:[%s1519_s2 + $0x8] sm:$0xff]   ;;  %v1271_v1 = vmov 0.0   ;;  %v1186_v2 = vld [vmem:[%s1519_s2] sm:$0xff]   ;;  %vm1272_vm0 = vmmov 0   ;;  %s230_s9 = scalar_select %p229_p10, %s1332_s22, 1  ;;  %vm256_vm1 = vcmask 261120  }
  0x14   : > { %1061 = vmatprep.subr.bf16.mxu1 %v1271_v1  ;;  %1077 = vmatprep.subr.bf16.mxu0 %v1271_v1  ;;  %v1187_v3 = vld [vmem:[%s1520_s3 + $0x8] sm:$0xff]   ;;  %v1188_v5 = vld [vmem:[%s1520_s3] sm:$0xff]   ;;  %vm362_vm2 = vcmask 130048   ;;  %vm409_vm3 = vcmask 64512   ;;  %vm428_vm4 = vcmask 1043456   ;;  %vm473_vm5 = vcmask 125952  }
  0x15   : > { %1062 = vmatpush3.bf16.msra.mxu1 %v1185_v0  ;;  %1065 = vmatprep.mubr.msk.bf16.mxu1 %vm1272_vm0, %v1271_v1  ;;  %s1003_s10 = sshll.u32 %s230_s9, 2  ;;  %s1277_s9 = smov 32   ;;  %vm593_vm6 = vcmask 257152   ;;  %vm712_vm7 = vcmask 388352   ;;  %vm831_vm8 = vcmask 519552   ;;  %vm866_vm9 = vcmask 523264  }
  0x16   : > { %1063 = vmatprep.subr.bf16.mxu1 %v1271_v1  ;;  %1079 = vmatprep.mubr.msk.bf16.mxu0 %vm1272_vm0, %v1271_v1  ;;  %s232_s15 = scalar_lea.vmem %s1517_s0, %s1003_s10  ;;  %s236_s26 = scalar_lea.vmem %s1518_s1, %s1003_s10  ;;  %vm911_vm10 = vcmask 257024  }
  0x17   : > { %v238_v4 = vld [vmem:[%s232_s15] sm:$0xf]  ;;  %s1278_s10 = smov 16   ;;  %s1215_s15 = scalar_lea.vmem %s1214_s14, 128 }
  0x18   : > { %v239_v6 = vld [vmem:[%s236_s26] sm:$0xf]  ;;  %s226_s26 = sand.u32 1, %s1261_s19  }
  0x19   : > { %1064 = vmatpush3.bf16.msra.mxu1 %v1186_v2  ;;  %s914_s12 = scalar_lea.sflag [#allocation4], %s226_s26 }
  0x1a   : > { %1069 = vmatprep.subr.bf16.mxu1 %v1271_v1 }
  0x1c   : > { %1066 = vmatmul.mubr.msk.bf16.vlgmr.msra.gmra.mxu1 %vm256_vm1, %v238_v4 }
  0x1d   : > { %1070 = vmatpush3.bf16.msra.mxu1 %v1187_v3  ;;  %1073 = vmatprep.mubr.msk.bf16.mxu1 %vm1272_vm0, %v1271_v1 }
  0x1e   : > { %1071 = vmatprep.subr.bf16.mxu1 %v1271_v1 }
  0x21   : > { %1072 = vmatpush3.bf16.msra.mxu1 %v1188_v5 }
  0x22   : > { %1083 = vmatprep.subr.bf16.mxu1 %v1271_v1 }
  0x24   : > { %1074 = vmatmul.mubr.msk.bf16.vlgmr.msra.gmra.mxu1 %vm256_vm1, %v239_v6 }
  0x25   : > { %1085 = vmatprep.mubr.msk.bf16.mxu1 %vm1272_vm0, %v1271_v1 }
  0xdc   : > { %v294_v7 = vpop.f32.mrf.mxu1 }
  0xdd   : > { %v359_v12 = vmul.f32 0.25, %v294_v7 }
  0xde   : > { %v1067_v8 = vpop.f32.mrf.mxu1 }
  0xdf   : > { %v360_v17 = vpack.c.bf16 %v359_v12, %v359_v12 }
  0xe0   : > { %v297_v9 = vpop.f32.mrf.mxu1 }
  0xe2   : > { %v1068_v10 = vpop.f32.mrf.mxu1 }
  0xe4   : > { %v353_v11 = vpop.f32.mrf.mxu1 }
  0xe5   : > { %v1395_v13 = vpack.c.bf16 %v353_v11, %v353_v11 }
  0xe6   : > { %v1075_v14 = vpop.f32.mrf.mxu1 }
  0xe7   : > { %597 = vrot.lane.b32.xlu1 %v1395_v13, %s1273_s30  ;;  %478 = vrot.lane.b32.xlu0 %v1395_v13, %s1274_s6  ;;  %v367_v15 = vsel %vm362_vm2, %v1395_v13, 0 }
  0xe8   : > { %v356_v16 = vpop.f32.mrf.mxu1  ;;  %1078 = vmatpush3.bf16.xpose.msra.mxu0 %v367_v15 }
  0xe9   : > { %1089 = vmatprep.subr.bf16.mxu0 %v1271_v1 }
  0xea   : > { %v1076_v18 = vpop.f32.mrf.mxu1 }
  0xeb   : > { %595 = vrot.lane.b32.xlu1 %v360_v17, %s1273_s30  ;;  %476 = vrot.lane.b32.xlu0 %v360_v17, %s1274_s6  ;;  %s1002_s30 = sshll.u32 %s226_s26, 2  ;;  %s1028_s6 = sshll.u32 %s1332_s22, 6 }
  0xef   : > { %714 = vrot.lane.b32.xlu1 %v360_v17, %s1275_s7  ;;  %716 = vrot.lane.b32.xlu0 %v1395_v13, %s1275_s7  ;;  %s228_s7 = scalar_lea.vmem [#allocation3], %s1002_s30 }
  0xf0   : > { %1080 = vmatmul.mubr.msk.bf16.vlgmr.msra.gmra.mxu0 %vm362_vm2, %v360_v17 }
  0xf1   : > { %1091 = vmatprep.mubr.msk.bf16.mxu0 %vm1272_vm0, %v1271_v1 }
 0x159   : > { %v479_v19 = vpop.permute.xlu0 %478  ;;  %v598_v21 = vpop.permute.xlu1 %597 }
 0x15a   : > { %v484_v20 = vsel %vm362_vm2, %v479_v19, 0  ;;  %v603_v23 = vsel %vm362_vm2, %v598_v21, 0 }
 0x15b   : > { %1090 = vmatpush3.bf16.xpose.msra.mxu0 %v484_v20 }
 0x15c   : > { %1101 = vmatprep.subr.bf16.mxu0 %v1271_v1 }
 0x15d   : > { %v477_v22 = vpop.permute.xlu0 %476  ;;  %v596_v25 = vpop.permute.xlu1 %595 }
 0x161   : > { %v717_v24 = vpop.permute.xlu0 %716  ;;  %v715_v27 = vpop.permute.xlu1 %714 }
 0x162   : > { %1092 = vmatmul.mubr.msk.bf16.vlgmr.msra.gmra.mxu0 %vm362_vm2, %v477_v22  ;;  %v722_v26 = vsel %vm362_vm2, %v717_v24, 0 }
 0x163   : > { %1102 = vmatpush3.bf16.xpose.msra.mxu0 %v603_v23  ;;  %1103 = vmatprep.mubr.msk.bf16.mxu0 %vm1272_vm0, %v1271_v1 }
 0x164   : > { %1113 = vmatprep.subr.bf16.mxu0 %v1271_v1 }
 0x16a   : > { %1104 = vmatmul.mubr.msk.bf16.vlgmr.msra.gmra.mxu0 %vm362_vm2, %v596_v25 }
 0x16b   : > { %1114 = vmatpush3.bf16.xpose.msra.mxu0 %v722_v26  ;;  %1115 = vmatprep.mubr.msk.bf16.mxu0 %vm1272_vm0, %v1271_v1 }
 0x16c   : > { %1125 = vmatprep.subr.bf16.mxu0 %v1271_v1 }
 0x172   : > { %1116 = vmatmul.mubr.msk.bf16.vlgmr.msra.gmra.mxu0 %vm362_vm2, %v715_v27 }
 0x173   : > { %1133 = vmatprep.mubr.msk.bf16.mxu0 %vm1272_vm0, %v1271_v1 }
 0x1b0   : > { %v403_v28 = vpop.f32.mrf.mxu0 }
 0x1b1   : > { %v410_v29 = vsel %vm409_vm3, %v403_v28, -inf }
 0x1b2   : > { %411 = vmax.xlane.f32.xlu0 %v410_v29  ;;  %v1081_v30 = vpop.f32.mrf.mxu0 }
 0x1b4   : > { %v406_v31 = vpop.f32.mrf.mxu0 }
 0x1b6   : > { %v1082_v32 = vpop.f32.mrf.mxu0 }
 0x222   : > { %v520_v33 = vpop.f32.mrf.mxu0 }
 0x223   : > { %v526_v34 = vsel %vm409_vm3, %v520_v33, -inf }
 0x224   : > { %527 = vmax.xlane.f32.xlu1 %v526_v34  ;;  %v1093_v35 = vpop.f32.mrf.mxu0  ;;  %v1189_v34 = vld [vmem:[%s1521_s4 + $0x18] sm:$0xff]  }
 0x225   : > { %1126 = vmatpush3.bf16.msra.mxu0 %v1189_v34 }
 0x226   : > { %v523_v36 = vpop.f32.mrf.mxu0  ;;  %1127 = vmatprep.subr.bf16.mxu0 %v1271_v1 }
 0x227   : > { %v1190_v36 = vld [vmem:[%s1521_s4 + $0x10] sm:$0xff]  }
 0x228   : > { %v1094_v37 = vpop.f32.mrf.mxu0 }
 0x229   : > { %1128 = vmatpush3.bf16.msra.mxu0 %v1190_v36 }
 0x22a   : > { %v639_v38 = vpop.f32.mrf.mxu0  ;;  %1129 = vmatprep.subr.bf16.mxu0 %v1271_v1 }
 0x22b   : > { %v645_v39 = vsel %vm409_vm3, %v639_v38, -inf }
 0x22c   : > { %646 = vmax.xlane.f32.xlu0 %v645_v39  ;;  %v1105_v40 = vpop.f32.mrf.mxu0 }
 0x22e   : > { %v642_v41 = vpop.f32.mrf.mxu0 }
 0x22f   : > { %v1191_v41 = vld [vmem:[%s1521_s4 + $0x8] sm:$0xff]  }
 0x230   : > { %v1106_v42 = vpop.f32.mrf.mxu0  ;;  %1130 = vmatpush3.bf16.msra.mxu0 %v1191_v41 }
 0x231   : > { %1131 = vmatprep.subr.bf16.mxu0 %v1271_v1 }
 0x232   : > { %v758_v43 = vpop.f32.mrf.mxu0 }
 0x233   : > { %v764_v44 = vsel %vm409_vm3, %v758_v43, -inf }
 0x234   : > { %765 = vmax.xlane.f32.xlu0 %v764_v44  ;;  %v1117_v45 = vpop.f32.mrf.mxu0 }
 0x236   : > { %v761_v46 = vpop.f32.mrf.mxu0 }
 0x238   : > { %v1118_v47 = vpop.f32.mrf.mxu0 }
 0x23b   : > { %v412_v48 = vpop.xlane.xlu0 %411 }
 0x23c   : > { %v413_v49 = vsub.f32 %v403_v28, %v412_v48 }
 0x23e   : > { %v414_v50 = vmul.f32 1.442695, %v413_v49 }
 0x240   : > { %1193 = vpow2.f32 %v414_v50 }
 0x24d   : > { %v1194_v51 = vpop.eup %1193 }
 0x24e   : > { %v416_v52 = vsel %vm409_vm3, %v1194_v51, 0.0 }
 0x24f   : > { %417 = vadd.xlane.f32.xlu1 %v416_v52 }
 0x260   : > { %423 = vrot.lane.b32.xlu1 %v1395_v13, %s1276_s8  ;;  %s927_s8 = sshll.u32 %s228_s7, 4  ;;  %s1478_s8 = int_to_ptr.vmem [resolvable:$true] %s927_s8 }
 0x261   : > { %s1209_s22 = scalar_lea.vmem %s1478_s8, 64  ;;  %p1216_p0 = scmp.lt.s32.totalorder %s1478_s8, %s1214_s14 }
 0x262   : > { %p1210_p11 = scmp.ne.s32.totalorder %s1478_s8, %s1209_s22  ;;  %p1217_p1 = scmp.lt.s32.totalorder %s1215_s15, %s1209_s22 }
 0x264   : > { %p1211_p12 = pnand %p1210_p11, %p1349_p5  ;;  %p1218_p2 = por %p1217_p1, %p1216_p0 }
 0x266   : > { %p1212_p13 = pneg %p1211_p12 }
 0x268   : > { %p1219_p3 = pnand %p1218_p2, %p1212_p13 }
 0x2ad   : > { %v528_v53 = vpop.xlane.xlu1 %527 }
 0x2ae   : > { %v529_v54 = vsub.f32 %v520_v33, %v528_v53 }
 0x2b0   : > { %v530_v55 = vmul.f32 1.442695, %v529_v54 }
 0x2b2   : > { %1195 = vpow2.f32 %v530_v55 }
 0x2b5   : > { %v647_v56 = vpop.xlane.xlu0 %646 }
 0x2b6   : > { %v648_v57 = vsub.f32 %v639_v38, %v647_v56 }
 0x2b8   : > { %v649_v58 = vmul.f32 1.442695, %v648_v57 }
 0x2ba   : > { %1197 = vpow2.f32 %v649_v58 }
 0x2bd   : > { %v766_v59 = vpop.xlane.xlu0 %765 }
 0x2be   : > { %v767_v60 = vsub.f32 %v758_v43, %v766_v59  ;;  %v1192_v43 = vld [vmem:[%s1521_s4] sm:$0xff]  }
 0x2bf   : > { %v1196_v61 = vpop.eup %1195  ;;  %1132 = vmatpush3.bf16.msra.mxu0 %v1192_v43 }
 0x2c0   : > { %v768_v62 = vmul.f32 1.442695, %v767_v60  ;;  %v532_v63 = vsel %vm409_vm3, %v1196_v61, 0.0 }
 0x2c1   : > { %533 = vadd.xlane.f32.xlu0 %v532_v63 }
 0x2c2   : > { %1199 = vpow2.f32 %v768_v62 }
 0x2c7   : > { %v1198_v0 = vpop.eup %1197 }
 0x2c8   : > { %v651_v2 = vsel %vm409_vm3, %v1198_v0, 0.0 }
 0x2c9   : > { %652 = vadd.xlane.f32.xlu1 %v651_v2 }
 0x2cf   : > { %v1200_v3 = vpop.eup %1199 }
 0x2d0   : > { %v770_v4 = vsel %vm409_vm3, %v1200_v3, 0.0 }
 0x2d1   : > { %771 = vadd.xlane.f32.xlu0 %v770_v4 }
 0x2d8   : > { %v418_v5 = vpop.xlane.xlu1 %417 }
 0x2d9   : > { %1201 = vrcp.f32 %v418_v5 }
 0x2da   : > { %657 = vrot.lane.b32.xlu1 %v1395_v13, %s1277_s9 }
 0x2dc   : > { %v424_v6 = vpop.permute.xlu1 %423 }
 0x2dd   : > { %v430_v7 = vsel %vm428_vm4, %v424_v6, 0 }
 0x2de   : > { %1084 = vmatpush3.bf16.msra.mxu1 %v430_v7  ;;  %776 = vrot.lane.b32.xlu1 %v1395_v13, %s1278_s10 }
 0x2df   : > { %1095 = vmatprep.subr.bf16.mxu1 %v1271_v1 }
 0x2e6   : > { %v1202_v8 = vpop.eup %1201 }
 0x2e7   : > { %538 = vrot.lane.b32.xlu0 %v1395_v13, %s1279_s11  ;;  %v420_v9 = vmul.f32 %v1202_v8, %v1194_v51 }
 0x2e9   : > { %v421_v10 = vpack.c.bf16 %v420_v9, %v420_v9 }
 0x2eb   : > { %1086 = vmatmul.mubr.msk.bf16.vlgmr.msra.gmra.mxu1 %vm409_vm3, %v421_v10 }
 0x2ec   : > { %1097 = vmatprep.mubr.msk.bf16.mxu1 %vm1272_vm0, %v1271_v1 }
 0x34a   : > { %v534_v11 = vpop.xlane.xlu0 %533 }
 0x34b   : > { %1203 = vrcp.f32 %v534_v11 }
 0x352   : > { %v653_v12 = vpop.xlane.xlu1 %652 }
 0x353   : > { %1205 = vrcp.f32 %v653_v12 }
 0x356   : > { %v658_v19 = vpop.permute.xlu1 %657 }
 0x357   : > { %v663_v21 = vsel %vm428_vm4, %v658_v19, 0 }
 0x358   : > { %v1204_v14 = vpop.eup %1203 }
 0x359   : > { %v536_v16 = vmul.f32 %v1204_v14, %v1196_v61 }
 0x35a   : > { %v772_v15 = vpop.xlane.xlu0 %771  ;;  %v777_v23 = vpop.permute.xlu1 %776 }
 0x35b   : > { %1207 = vrcp.f32 %v772_v15  ;;  %v537_v13 = vpack.c.bf16 %v536_v16, %v536_v16  ;;  %v782_v26 = vsel %vm428_vm4, %v777_v23, 0 }
 0x35e   : > { %v539_v17 = vpop.permute.xlu0 %538 }
 0x35f   : > { %v544_v18 = vsel %vm428_vm4, %v539_v17, 0 }
 0x360   : > { %1096 = vmatpush3.bf16.msra.mxu1 %v544_v18  ;;  %v1206_v20 = vpop.eup %1205 }
 0x361   : > { %1107 = vmatprep.subr.bf16.mxu1 %v1271_v1  ;;  %v655_v22 = vmul.f32 %v1206_v20, %v1198_v0 }
 0x363   : > { %1098 = vmatmul.mubr.msk.bf16.vlgmr.msra.gmra.mxu1 %vm409_vm3, %v537_v13  ;;  %v656_v24 = vpack.c.bf16 %v655_v22, %v655_v22 }
 0x364   : > { %1108 = vmatpush3.bf16.msra.mxu1 %v663_v21  ;;  %1109 = vmatprep.mubr.msk.bf16.mxu1 %vm1272_vm0, %v1271_v1 }
 0x365   : > { %1119 = vmatprep.subr.bf16.mxu1 %v1271_v1 }
 0x368   : > { %v1208_v25 = vpop.eup %1207 }
 0x369   : > { %v774_v27 = vmul.f32 %v1208_v25, %v1200_v3 }
 0x36b   : > { %1110 = vmatmul.mubr.msk.bf16.vlgmr.msra.gmra.mxu1 %vm409_vm3, %v656_v24  ;;  %v775_v28 = vpack.c.bf16 %v774_v27, %v774_v27 }
 0x36c   : > { %1120 = vmatpush3.bf16.msra.mxu1 %v782_v26  ;;  %1121 = vmatprep.mubr.msk.bf16.mxu1 %vm1272_vm0, %v1271_v1 }
 0x373   : > { %1122 = vmatmul.mubr.msk.bf16.vlgmr.msra.gmra.mxu1 %vm409_vm3, %v775_v28 }
 0x3ab   : > { %v466_v29 = vpop.f32.mrf.mxu1 }
 0x3ac   : > { %v472_v30 = vpack.c.bf16 %v466_v29, %v466_v29 }
 0x3ad   : > { %v1087_v31 = vpop.f32.mrf.mxu1 }
 0x3ae   : > { %474 = vst.msk [vmem:[#allocation2] sm:$0xf] %vm473_vm5, %v472_v30 }
 0x3af   : > { %v469_v32 = vpop.f32.mrf.mxu1 }
 0x3b1   : > { %v1088_v33 = vpop.f32.mrf.mxu1 }
 0x423   : > { %v580_v35 = vpop.f32.mrf.mxu1 }
 0x424   : > { %v1031_v37 = vpack.c.bf16 %v580_v35, %v580_v35 }
 0x425   : > { %v1099_v38 = vpop.f32.mrf.mxu1 }
 0x426   : > { %590 = vrot.lane.b32.xlu0 %v1031_v37, %s1278_s10 }
 0x427   : > { %v583_v39 = vpop.f32.mrf.mxu1 }
 0x429   : > { %v1100_v40 = vpop.f32.mrf.mxu1 }
 0x42b   : > { %v699_v42 = vpop.f32.mrf.mxu1 }
 0x42c   : > { %v1032_v44 = vpack.c.bf16 %v699_v42, %v699_v42 }
 0x42d   : > { %v1111_v45 = vpop.f32.mrf.mxu1 }
 0x42e   : > { %709 = vrot.lane.b32.xlu1 %v1032_v44, %s1277_s9 }
 0x42f   : > { %v702_v46 = vpop.f32.mrf.mxu1 }
 0x431   : > { %v1112_v47 = vpop.f32.mrf.mxu1 }
 0x433   : > { %v818_v48 = vpop.f32.mrf.mxu1 }
 0x434   : > { %v1033_v49 = vpack.c.bf16 %v818_v48, %v818_v48 }
 0x435   : > { %v1123_v50 = vpop.f32.mrf.mxu1 }
 0x436   : > { %828 = vrot.lane.b32.xlu0 %v1033_v49, %s1279_s11  ;;  %s1476_s11 = scalar_lea.hbm %s1522_s5, %s1028_s6 }
 0x437   : > { %v821_v51 = vpop.f32.mrf.mxu1 }
 0x439   : > { %v1124_v52 = vpop.f32.mrf.mxu1 }
 0x498   : > { %v591_v53 = vpop.permute.xlu0 %590 }
 0x499   : > { %594 = vst.msk [vmem:[#allocation2] sm:$0xf] %vm593_vm6, %v591_v53 }
 0x4a0   : > { %v710_v1 = vpop.permute.xlu1 %709 }
 0x4a1   : > { %713 = vst.msk [vmem:[#allocation2] sm:$0xf] %vm712_vm7, %v710_v1 }
 0x4a8   : > { %v829_v54 = vpop.permute.xlu0 %828 }
 0x4a9   : > { %832 = vst.msk [vmem:[#allocation2] sm:$0xf] %vm831_vm8, %v829_v54 }
 0x4b0   : > { %v833_v55 = vld [vmem:[#allocation2] sm:$0xf] }
 0x4b1   : > { %1134 = vmatmul.mubr.msk.bf16.vlgmr.msra.gmra.mxu0 %vm866_vm9, %v833_v55 }
 0x571   : > { %v904_v56 = vpop.f32.mrf.mxu0 }
 0x572   : > { %v910_v57 = vpack.c.bf16 %v904_v56, %v904_v56 }
 0x573   : > { %v1135_v58 = vpop.f32.mrf.mxu0 }
 0x574   : > { %912 = vst.msk [vmem:[%s228_s7] sm:$0xf] %vm911_vm10, %v910_v57 }
 0x575   : > { %v907_v59 = vpop.f32.mrf.mxu0 }
 0x576   : > { %1222 = shalt.err (!%p1219_p3)
}
 0x577   : > { %s1223_s16 = scalar_lea.hbm %s1476_s11, 64  ;;  %s1227_s25 = scalar_lea.hbm %s1522_s5, 128 }
 0x578   : > { %p1224_p4 = scmp.ne.s32.totalorder %s1476_s11, %s1223_s16  ;;  %p1228_p9 = scmp.lt.s32.totalorder %s1476_s11, %s1522_s5 }
 0x579   : > { %p1229_p10 = scmp.lt.s32.totalorder %s1227_s25, %s1223_s16 }
 0x57a   : > { %p1225_p7 = pnand %p1224_p4, %p1349_p5 }
 0x57b   : > { %p1230_p11 = por %p1229_p10, %p1228_p9 }
 0x57c   : > { %p1226_p8 = pneg %p1225_p7 }
 0x57e   : > { %p1231_p12 = pnand %p1230_p11, %p1226_p8 }
 0x580   : > { %1234 = shalt.err (!%p1231_p12)
}
 0x581   : > { %1137 = dma.vmem_to_hbm [thread:$0]  (%p1349_p5), %s1478_s8, 64, %s1476_s11, %s914_s12   ;;  %v1136_v60 = vpop.f32.mrf.mxu0 }
 0x582 PF: > { %p1143_p13 = scmp.ge.s32.totalorder %s1269_s21, 2  ;;  %s939_s6 = sand.u32 1, %s1257_s18  }
 0x583   : > { %s940_s7 = scalar_lea.sflag [#allocation4], %s939_s6 }
 0x584   : > { %p1140_p0 = pnand %p1143_p13, %p1353_p6 }
 0x586   : > { %p1141_p1 = pneg %p1140_p0 }
 0x588   : > { %1252 = dma.done.wait (%p1141_p1), %s940_s7, 64  }
 0x589   : > { %1254 = vsyncadd (%p1141_p1), %s940_s7, 4294967232  ;;  %p15_p2 = scmp.ge.s32.totalorder %s1336_s24, 4   ;;  %s1525_s18 = smov %s1261_s19 }
 0x58a   : > { %s1526_s19 = smov %s1265_s20  ;;  %s1527_s20 = smov %s1347_s27 }
 0x58b   : > { %s1528_s21 = smov %s1336_s24  ;;  %17 = sbr.rel (!%p15_p2) target bundleno = 3 (0x3), region = 78 }
 0x590   :  { %945 = vsyncpa [#allocation4], 1 }
 0x591   :  { %947 = vsyncpa [#allocation4 + $0x1], 1 }

</bundles_post_ra>
